<compile_context>
chip_gen: v6e
topology: v6e:2x2x1
jax: 0.10.0
libtpu: 0.0.40
codegen_flags: <defaults>
</compile_context>

<pallas_src>
import jax
import jax.numpy as jnp
from jax.experimental import pallas as pl
from jax.experimental.pallas import tpu as pltpu

LANES = 128


def _sublane_multiple(dtype) -> int:
    """Minimum legal sublane-tile multiple for a (possibly packed) dtype."""
    itemsize = jnp.dtype(dtype).itemsize
    return 8 * max(1, 4 // itemsize)


def _make_l1_sum_kernel(tile, lane_c, rows, vreg_acc):
    """Build the partial-L1-sum kernel with all shape facts baked in statically.

    Operates on a (rows, lane_c) slab tiled as (tile, lane_c) blocks.
      * vreg_acc=True  -> (8, lane_c) accumulator fed by a tile-aligned
        (tile//8, 8, lane_c) VALU reduction (fast lane-dense path).
      * vreg_acc=False -> full-tile accumulator (robust path for odd shapes).
    Only the (possible) partial last tile pays for the row mask.
    """
    n_tiles = -(-rows // tile)
    last = n_tiles - 1
    partial_last = (rows % tile) != 0
    valid_last_rows = rows - last * tile          # static, in (0, tile]

    def _reduce(diff):
        if vreg_acc:
            # Tile-aligned regroup: the sum over the leading axis is a pure
            # VALU add-tree across vregs (no relayout, no XLU, no per-vreg
            # accumulator read-modify-write).
            return diff.reshape(tile // 8, 8, lane_c).sum(axis=0)
        return diff

    def kernel(a_ref, b_ref, out_ref, acc_ref):
        i = pl.program_id(0)

        @pl.when(i == 0)
        def _():
            acc_ref[...] = jnp.zeros_like(acc_ref)

        diff = jnp.abs(a_ref[...].astype(jnp.float32)
                       - b_ref[...].astype(jnp.float32))

        if partial_last:
            @pl.when(i != last)
            def _():
                acc_ref[...] += _reduce(diff)

            @pl.when(i == last)
            def _():
                # Rows at/after `rows` are the undefined pad region of the
                # partial boundary block: select them to zero (static bound).
                row_ids = jax.lax.broadcasted_iota(jnp.int32, (tile, lane_c), 0)
                acc_ref[...] += _reduce(
                    jnp.where(row_ids < valid_last_rows, diff, 0.0))
        else:
            acc_ref[...] += _reduce(diff)

        @pl.when(i == last)
        def _():
            out_ref[0, 0] = jnp.sum(acc_ref[...])

    return kernel, n_tiles


def _l1_sum_2d(a2, b2, block_budget_bytes):
    """Sum of |a2 - b2| over a 2-D slab via a single-axis streaming reduction."""
    rows, lane_c = a2.shape
    itemsize = max(jnp.dtype(a2.dtype).itemsize, jnp.dtype(b2.dtype).itemsize)
    sub = max(_sublane_multiple(a2.dtype), _sublane_multiple(b2.dtype))

    # Rows per block from the byte budget, rounded to the packed-dtype sublane
    # multiple; a block equal to the full row extent is always legal.
    cap_rows = max(sub, (block_budget_bytes // (lane_c * itemsize)) // sub * sub)
    tile = rows if rows <= cap_rows else cap_rows

    vreg_acc = (tile % 8 == 0) and (lane_c % LANES == 0)
    acc_shape = (8, lane_c) if vreg_acc else (tile, lane_c)

    kernel, n_tiles = _make_l1_sum_kernel(tile, lane_c, rows, vreg_acc)

    block_bytes = tile * lane_c * itemsize
    acc_bytes = acc_shape[0] * acc_shape[1] * 4
    # 2 inputs x 2 pipeline buffers + accumulator + headroom; clamp to a range
    # that is safe on v5e/v6e (128 MiB physical) and v7x (64 MiB physical).
    vmem_limit = int(min(48 << 20,
                         max(16 << 20, 4 * block_bytes + acc_bytes + (2 << 20))))

    total = pl.pallas_call(
        kernel,
        out_shape=jax.ShapeDtypeStruct((1, 1), jnp.float32),
        grid_spec=pltpu.PrefetchScalarGridSpec(
            num_scalar_prefetch=0,
            grid=(n_tiles,),
            in_specs=[
                pl.BlockSpec((tile, lane_c), lambda i: (i, 0)),
                pl.BlockSpec((tile, lane_c), lambda i: (i, 0)),
            ],
            out_specs=pl.BlockSpec((1, 1), lambda i: (0, 0),
                                   memory_space=pltpu.SMEM),
            scratch_shapes=[pltpu.VMEM(acc_shape, jnp.float32)],
        ),
        compiler_params=pltpu.CompilerParams(
            dimension_semantics=("arbitrary",),
            vmem_limit_bytes=vmem_limit),
    )(a2, b2)
    return total[0, 0]


def airlight_loss(estimated_airlight, gt_airlight, *, tile_rows=2048):
    """Mean L1 loss, exactly F.l1_loss(est, gt, reduction='mean')."""
    est, gt = estimated_airlight, gt_airlight
    assert est.shape == gt.shape, "l1_loss requires matching shapes"
    assert tile_rows >= 8, "tile_rows must be >= 8"
    n_elem = est.size
    assert n_elem > 0

    # Per-input block byte budget (tile_rows rows of a 128-lane f32 slab),
    # capped at 4 MiB so 2 inputs x 2 buffers never crowd scoped VMEM.
    block_budget = min(tile_rows * LANES * 4, 4 << 20)

    itemsize = max(jnp.dtype(est.dtype).itemsize, jnp.dtype(gt.dtype).itemsize)
    sub = max(_sublane_multiple(est.dtype), _sublane_multiple(gt.dtype))

    if n_elem % LANES == 0:
        # Fast path: free bitcast reshape to a lane-dense (rows, 128) slab.
        a2 = jnp.ravel(est).reshape(n_elem // LANES, LANES)
        b2 = jnp.ravel(gt).reshape(n_elem // LANES, LANES)
    else:
        lane_c = est.shape[-1] if est.ndim >= 2 else 1
        if lane_c * itemsize * sub <= (1 << 20):
            # Zero-copy generic framing: collapse leading dims, keep the
            # contiguous last dim as a full-extent lane dimension.  Avoids the
            # HBM pad copy of both inputs that jnp.pad would materialize.
            a2 = est.reshape(-1, lane_c)
            b2 = gt.reshape(-1, lane_c)
        else:
            # Pathological shape (enormous unaligned last dim): fall back to a
            # padded 128-lane slab (costs one extra HBM copy; |0-0| = 0).
            pad = LANES - n_elem % LANES
            a2 = jnp.pad(jnp.ravel(est), (0, pad)).reshape(-1, LANES)
            b2 = jnp.pad(jnp.ravel(gt), (0, pad)).reshape(-1, LANES)

    total = _l1_sum_2d(a2, b2, block_budget)
    # Normalize by the TRUE element count (masked / padded elements excluded).
    return (total / jnp.float32(n_elem)).astype(jnp.float32)


if __name__ == "__main__":
    key = jax.random.PRNGKey(0)
    k1, k2, k3, k4, k5, k6 = jax.random.split(key, 6)

    # 1) Lane-aligned NCHW f32 (common case): single-tile, vreg-accumulator path.
    est = jax.random.uniform(k1, (2, 4, 16, 16), dtype=jnp.float32)
    gt = jax.random.uniform(k2, (2, 4, 16, 16), dtype=jnp.float32)
    ref = jnp.mean(jnp.abs(est - gt))
    loss = jax.block_until_ready(airlight_loss(est, gt))
    assert jnp.allclose(loss, ref, rtol=1e-5, atol=1e-6), (loss, ref)

    # 2) Same data, tiny tile budget: multi-step accumulation, full tiles only.
    loss2 = jax.block_until_ready(airlight_loss(est, gt, tile_rows=8))
    assert jnp.allclose(loss2, ref, rtol=1e-5, atol=1e-6), (loss2, ref)

    # 3) Aligned size with a partial boundary tile: masked last-tile branch.
    est3 = jax.random.uniform(k3, (2, 4, 16, 20), dtype=jnp.float32)   # 2560 elems
    gt3 = jax.random.uniform(k4, (2, 4, 16, 20), dtype=jnp.float32)
    ref3 = jnp.mean(jnp.abs(est3 - gt3))
    loss3 = jax.block_until_ready(airlight_loss(est3, gt3, tile_rows=8))
    assert jnp.allclose(loss3, ref3, rtol=1e-5, atol=1e-6), (loss3, ref3)

    # 4) Non-128-aligned element count: zero-copy generic (rows, last_dim) framing.
    est4 = jax.random.uniform(k5, (2, 3, 17, 19), dtype=jnp.float32)   # 1938 elems
    gt4 = jax.random.uniform(k6, (2, 3, 17, 19), dtype=jnp.float32)
    ref4 = jnp.mean(jnp.abs(est4 - gt4))
    loss4 = jax.block_until_ready(airlight_loss(est4, gt4))
    assert jnp.allclose(loss4, ref4, rtol=1e-5, atol=1e-6), (loss4, ref4)
    loss5 = jax.block_until_ready(airlight_loss(est4, gt4, tile_rows=8))  # multi-tile + mask
    assert jnp.allclose(loss5, ref4, rtol=1e-5, atol=1e-6), (loss5, ref4)

    # 5) bf16 inputs stream in native dtype; accumulation stays f32.
    est6 = est.astype(jnp.bfloat16)
    gt6 = gt.astype(jnp.bfloat16)
    ref6 = jnp.mean(jnp.abs(est6.astype(jnp.float32) - gt6.astype(jnp.float32)))
    loss6 = jax.block_until_ready(airlight_loss(est6, gt6))
    assert jnp.allclose(loss6, ref6, rtol=1e-5, atol=1e-6), (loss6, ref6)

    print("KERNEL_OK")
</pallas_src>

<mosaic_0001>
module attributes {stable_mosaic.version = 11 : i64} {
  func.func @kernel(%arg0: i32, %arg1: memref<16x128xf32, #tpu.memory_space<vmem>>, %arg2: memref<16x128xf32, #tpu.memory_space<vmem>>, %arg3: memref<1x1xf32, #tpu.memory_space<smem>>, %arg4: memref<8x128xf32, #tpu.memory_space<vmem>>) attributes {dimension_semantics = [#tpu.dimension_semantics<arbitrary>], iteration_bounds = array<i64: 1>, scalar_prefetch = 0 : i64, scratch_operands = 1 : i64, tpu.core_type = #tpu.core_type<tc>, window_params = [{transform_indices = @transform_0, window_bounds = array<i64: 16, 128>}, {transform_indices = @transform_1, window_bounds = array<i64: 16, 128>}, {transform_indices = @transform_2, window_bounds = array<i64: 1, 1>}]} {
    %c0_i32 = arith.constant 0 : i32
    %0 = arith.cmpi eq, %arg0, %c0_i32 : i32
    %1 = arith.extui %0 : i1 to i32
    %c0_i32_0 = arith.constant 0 : i32
    %2 = arith.cmpi ne, %1, %c0_i32_0 : i32
    scf.if %2 {
      %cst_10 = arith.constant 0.000000e+00 : f32
      %15 = vector.broadcast %cst_10 : f32 to vector<8x128xf32>
      %c0_11 = arith.constant 0 : index
      %c0_12 = arith.constant 0 : index
      %16 = vector.load %arg4[%c0_11, %c0_12] : memref<8x128xf32, #tpu.memory_space<vmem>>, vector<8x128xf32>
      tpu.vector_store %arg4[%c0_11, %c0_12], %15 {strides = array<i32>} : memref<8x128xf32, #tpu.memory_space<vmem>>, vector<8x128xf32>,
    } else {
    }
    %c0 = arith.constant 0 : index
    %c0_1 = arith.constant 0 : index
    %3 = vector.load %arg1[%c0, %c0_1] : memref<16x128xf32, #tpu.memory_space<vmem>>, vector<16x128xf32>
    %c0_2 = arith.constant 0 : index
    %c0_3 = arith.constant 0 : index
    %4 = vector.load %arg2[%c0_2, %c0_3] : memref<16x128xf32, #tpu.memory_space<vmem>>, vector<16x128xf32>
    %5 = arith.subf %3, %4 : vector<16x128xf32>
    %6 = math.absf %5 : vector<16x128xf32>
    %c0_4 = arith.constant 0 : index
    %c0_5 = arith.constant 0 : index
    %7 = vector.load %arg4[%c0_4, %c0_5] : memref<8x128xf32, #tpu.memory_space<vmem>>, vector<8x128xf32>
    %8 = vector.shape_cast %6 : vector<16x128xf32> to vector<2x8x128xf32>
    %cst = arith.constant dense<0.000000e+00> : vector<8x128xf32>
    %9 = vector.multi_reduction <add>, %8, %cst [0] : vector<2x8x128xf32> to vector<8x128xf32>
    %10 = arith.addf %7, %9 : vector<8x128xf32>
    %c0_6 = arith.constant 0 : index
    %c0_7 = arith.constant 0 : index
    %11 = vector.load %arg4[%c0_6, %c0_7] : memref<8x128xf32, #tpu.memory_space<vmem>>, vector<8x128xf32>
    tpu.vector_store %arg4[%c0_6, %c0_7], %10 {strides = array<i32>} : memref<8x128xf32, #tpu.memory_space<vmem>>, vector<8x128xf32>,
    %c0_i32_8 = arith.constant 0 : i32
    %12 = arith.cmpi eq, %arg0, %c0_i32_8 : i32
    %13 = arith.extui %12 : i1 to i32
    %c0_i32_9 = arith.constant 0 : i32
    %14 = arith.cmpi ne, %13, %c0_i32_9 : i32
    scf.if %14 {
      %c0_10 = arith.constant 0 : index
      %c0_11 = arith.constant 0 : index
      %15 = vector.load %arg4[%c0_10, %c0_11] : memref<8x128xf32, #tpu.memory_space<vmem>>, vector<8x128xf32>
      %16 = vector.shape_cast %15 : vector<8x128xf32> to vector<1x8x128xf32>
      %cst_12 = arith.constant dense<0.000000e+00> : vector<1xf32>
      %17 = vector.multi_reduction <add>, %16, %cst_12 [1, 2] : vector<1x8x128xf32> to vector<1xf32>
      %18 = vector.shape_cast %17 : vector<1xf32> to vector<1x1x1xf32>
      %19 = vector.extract %18[0, 0, 0] : f32 from vector<1x1x1xf32>
      %c0_13 = arith.constant 0 : index
      %c0_14 = arith.constant 0 : index
      %20 = memref.load %arg3[%c0_13, %c0_14] : memref<1x1xf32, #tpu.memory_space<smem>>
      memref.store %19, %arg3[%c0_13, %c0_14] : memref<1x1xf32, #tpu.memory_space<smem>>
    } else {
    }
    return
  }
  func.func @transform_0(%arg0: i32) -> (i32, i32) {
    %c0_i32 = arith.constant 0 : i32
    %c0_i32_0 = arith.constant 0 : i32
    return %arg0, %c0_i32 : i32, i32
  }
  func.func @transform_1(%arg0: i32) -> (i32, i32) {
    %c0_i32 = arith.constant 0 : i32
    %c0_i32_0 = arith.constant 0 : i32
    return %arg0, %c0_i32 : i32, i32
  }
  func.func @transform_2(%arg0: i32) -> (i32, i32) {
    %c0_i32 = arith.constant 0 : i32
    %c0_i32_0 = arith.constant 0 : i32
    %c0_i32_1 = arith.constant 0 : i32
    return %c0_i32, %c0_i32_0 : i32, i32
  }
}

</mosaic_0001>

<bundles_post_ra>
// kernel: tpu_custom_call.1
= control target key start
LH: loop header
LB: loop body
LE: loop exit
PB: predicated region body
PF: predicated region fallthrough
CT: control target
= control target key end

     0   :  { %7 = vsyncpa [#allocation4], 0  ;;  %s177_s0 = inlined_call_operand.hbm [shape: f32[16,128], index: 0, kind: input, shape index: {}]   ;;  %s178_s1 = inlined_call_operand.hbm [shape: f32[16,128], index: 1, kind: input, shape index: {}]   ;;  %s179_s2 = inlined_call_operand.hbm [shape: f32[1,1], index: 2, kind: output, shape index: {}]  }
   0x1   :  { %8 = vsyncpa [#allocation7], 0 }
   0x2   :  { %9 = vsyncpa [#allocation5], 0  ;;  %s148_s9 = smov [#allocation3]  }
   0x3   :  { %s15_s10 = sshll.u32 %s148_s9, 4  ;;  %s16_s10 = int_to_ptr.vmem [resolvable:$true] %s15_s10 }
   0x4   :  { %s102_s11 = scalar_lea.vmem %s16_s10, 256  ;;  %p107_p1 = scmp.lt.s32.totalorder %s16_s10, %s16_s10 }
   0x5   :  { %p103_p0 = scmp.ne.s32.totalorder %s16_s10, %s102_s11  ;;  %p108_p2 = scmp.lt.s32.totalorder %s102_s11, %s102_s11 }
   0x7   :  { %p109_p3 = por %p108_p2, %p107_p1 }
   0x9   :  { %p110_p4 = pnand %p109_p3, %p103_p0 }
   0xb   :  { %113 = shalt.err (!%p110_p4)
}
   0xc   :  { %s149_s12 = smov 128   ;;  %s150_s13 = smov 8  }
   0xd   :  { %21 = dma.hbm_to_vmem [thread:$0]  %s177_s0, 256, %s16_s10, [#allocation4], %s149_s12, %s149_s12, %s150_s13  }
   0xe   :  { %s151_s16 = smov [#allocation6]  }
   0xf   :  { %s27_s17 = sshll.u32 %s151_s16, 4  ;;  %s28_s17 = int_to_ptr.vmem [resolvable:$true] %s27_s17 }
  0x10   :  { %s122_s18 = scalar_lea.vmem %s28_s17, 256  ;;  %p127_p6 = scmp.lt.s32.totalorder %s28_s17, %s28_s17 }
  0x11   :  { %p123_p5 = scmp.ne.s32.totalorder %s28_s17, %s122_s18  ;;  %p128_p7 = scmp.lt.s32.totalorder %s122_s18, %s122_s18 }
  0x13   :  { %p129_p8 = por %p128_p7, %p127_p6 }
  0x15   :  { %p130_p9 = pnand %p129_p8, %p123_p5 }
  0x17   :  { %133 = shalt.err (!%p130_p9)
}
  0x18   :  { %33 = dma.hbm_to_vmem [thread:$0]  %s178_s1, 256, %s28_s17, [#allocation7], %s149_s12, %s149_s12, %s150_s13  }
  0x19   :  { %142 = dma.done.wait [#allocation4], 256  }
  0x1a   :  { %143 = vsyncadd [#allocation4], 4294967040 }
  0x1b   :  { %144 = dma.done.wait [#allocation7], 256  }
  0x1c   :  { %145 = vsyncadd [#allocation7], 4294967040  ;;  %v45_v0 = vld [vmem:[#allocation3] sm:$0xff]  ;;  %v46_v1 = vld [vmem:[#allocation3 + $0x8] sm:$0xff]  ;;  %s152_s1 = smov [#allocation8]  }
  0x1d   :  { %v47_v2 = vld [vmem:[#allocation6] sm:$0xff]  ;;  %v48_v3 = vld [vmem:[#allocation6 + $0x8] sm:$0xff] }
  0x1e   :  { %v49_v4 = vsub.f32 %v45_v0, %v47_v2  ;;  %v50_v5 = vsub.f32 %v46_v1, %v48_v3 }
  0x20   :  { %v51_v6 = vand.u32 2147483647, %v49_v4  ;;  %v52_v7 = vand.u32 2147483647, %v50_v5 }
  0x22   :  { %v54_v8 = vadd.f32 %v52_v7, %v51_v6 }
  0x24   :  { %61 = vadd.xlane.f32.xlu0 %v54_v8 }
  0xad   :  { %v62_v9 = vpop.xlane.xlu0 %61 }
  0xae   :  { %v63_v10 = vrot.slane %v62_v9, 4 }
  0xb0   :  { %v64_v11 = vadd.f32 %v63_v10, %v62_v9 }
  0xb2   :  { %v65_v12 = vrot.slane %v64_v11, 2 }
  0xb4   :  { %v66_v13 = vadd.f32 %v65_v12, %v64_v11 }
  0xb6   :  { %v67_v14 = vrot.slane %v66_v13, 1 }
  0xb8   :  { %v68_v15 = vadd.f32 %v67_v14, %v66_v13 }
  0xba   :  { %87 = vpush %v68_v15 }
  0xeb   :  { %s88_s0 = spop %87 }
  0xec   :  { %71 = sst [smem:[#allocation8]] %s88_s0 }
  0xed   :  { %79 = dma.smem_to_hbm %s152_s1, 16, %s179_s2, [#allocation5]  }
  0xee   :  { %146 = dma.done.wait [#allocation5], 16  }
  0xef   :  { %147 = vsyncadd [#allocation5], 4294967280 }
  0xf0   :  { %83 = sfence }
  0xf1   :  { %84 = vsyncpa [#allocation4], 1 }
  0xf2   :  { %85 = vsyncpa [#allocation7], 1 }
  0xf3   :  { %86 = vsyncpa [#allocation5], 1 }

</bundles_post_ra>
